<compile_context>
chip_gen: v7x
topology: tpu7x:2x2x1
jax: 0.10.0
libtpu: 0.0.40
codegen_flags: <defaults>
</compile_context>

<pallas_src>
import functools

import jax
import jax.numpy as jnp
from jax.experimental import pallas as pl
from jax.experimental.pallas import tpu as pltpu


# ----------------------------------------------------------------------------
# Pallas kernel: per-block squared-difference sums + final scalar loss.
# ----------------------------------------------------------------------------
def _tv_kernel(x_ref, wmask_ref, loss_ref, acc_ref, *,
               W, inv_count_h, inv_count_w, inv_batch):
    # x_ref    : (bb, H*W)   f32, one block of flattened (N*C, H*W) rows
    # wmask_ref: (1, H*W-1)  f32, 1.0 where a +1 neighbour is a real w-pair
    # loss_ref : (1, 1)      f32 SMEM scalar output
    # acc_ref  : (2,)        f32 SMEM scratch: [h_tv_sum, w_tv_sum]
    step = pl.program_id(0)

    @pl.when(step == 0)
    def _init():
        acc_ref[0] = jnp.float32(0.0)
        acc_ref[1] = jnp.float32(0.0)

    x = x_ref[...]                       # (bb, HW), lane-dense
    bb, HW = x.shape

    # h-direction: neighbour is W positions ahead in the flattened row.
    dh = x[:, W:] - x[:, :HW - W]        # (bb, (H-1)*W)
    h_part = jnp.sum(dh * dh)

    # w-direction: neighbour is 1 position ahead; mask out the last column of
    # each width-group (those pairs straddle two image rows).
    dw = x[:, 1:] - x[:, :HW - 1]        # (bb, HW-1)
    w_part = jnp.sum(dw * dw * wmask_ref[...])

    acc_ref[0] += h_part
    acc_ref[1] += w_part

    @pl.when(step == pl.num_programs(0) - 1)
    def _finalize():
        loss_ref[0, 0] = 2.0 * (acc_ref[0] * inv_count_h +
                                acc_ref[1] * inv_count_w) * inv_batch


# ----------------------------------------------------------------------------
# Wrapper: layout plumbing + pallas_call.
# ----------------------------------------------------------------------------
def tv_loss(x, *, block_rows=512):
    """x: (N, C, H, W) -> scalar TV loss (matches the PyTorch TVLoss)."""
    N, C, H, W = x.shape
    B = N * C
    HW = H * W

    # free row-major reshape to a lane-dense (rows, H*W) layout
    xf = x.reshape(B, HW).astype(jnp.float32)

    # row-block size: multiple of 8 sublanes, capped at ~4 MiB per block so
    # double-buffering stays far below VMEM on all generations (incl. v7x).
    # TODO(synk): for very large H*W, also tile the flattened H*W axis with a
    # W-element halo instead of keeping whole rows in one block.
    max_block_bytes = 4 * 1024 * 1024
    bb = max(8, (max_block_bytes // (HW * 4)) // 8 * 8)
    bb = min(bb, block_rows, ((B + 7) // 8) * 8)

    B_pad = pl.cdiv(B, bb) * bb
    if B_pad != B:
        # zero rows contribute exactly 0 to both sums
        xf = jnp.pad(xf, ((0, B_pad - B), (0, 0)))

    # multiplicative mask for the w-direction pairs (precomputed, stays
    # resident via a constant index_map; avoids per-element integer modulo).
    col = jnp.arange(HW - 1, dtype=jnp.int32)
    w_mask = ((col % W) != (W - 1)).astype(jnp.float32).reshape(1, HW - 1)

    kernel = functools.partial(
        _tv_kernel,
        W=W,
        inv_count_h=1.0 / float(C * (H - 1) * W),
        inv_count_w=1.0 / float(C * H * (W - 1)),
        inv_batch=1.0 / float(N))

    loss = pl.pallas_call(
        kernel,
        out_shape=jax.ShapeDtypeStruct((1, 1), jnp.float32),
        grid=(B_pad // bb,),
        in_specs=[
            pl.BlockSpec((bb, HW), lambda i: (i, 0)),        # row blocks
            pl.BlockSpec((1, HW - 1), lambda i: (0, 0)),     # resident mask
        ],
        out_specs=pl.BlockSpec((1, 1), lambda i: (0, 0),
                               memory_space=pltpu.MemorySpace.SMEM),
        scratch_shapes=[pltpu.SMEM((2,), jnp.float32)],
        compiler_params=pltpu.CompilerParams(
            dimension_semantics=("arbitrary",)),  # scalar-accumulating axis
    )(xf, w_mask)
    return loss[0, 0]


# ----------------------------------------------------------------------------
# Pure-JAX reference (correctness check only)
# ----------------------------------------------------------------------------
def tv_loss_ref(x):
    x = x.astype(jnp.float32)
    N, C, H, W = x.shape
    count_h = C * (H - 1) * W
    count_w = C * H * (W - 1)
    h_tv = jnp.sum((x[:, :, 1:, :] - x[:, :, :-1, :]) ** 2)
    w_tv = jnp.sum((x[:, :, :, 1:] - x[:, :, :, :-1]) ** 2)
    return 2.0 * (h_tv / count_h + w_tv / count_w) / N


# ----------------------------------------------------------------------------
if __name__ == "__main__":
    key = jax.random.PRNGKey(0)
    N, C, H, W = 2, 4, 16, 16
    x = jax.random.normal(key, (N, C, H, W), jnp.float32)

    loss_fn = jax.jit(tv_loss)
    loss = jax.block_until_ready(loss_fn(x))

    ref = tv_loss_ref(x)
    assert jnp.isfinite(loss), "kernel produced non-finite loss"
    assert abs(float(loss) - float(ref)) < 1e-4 * max(1.0, abs(float(ref))), (
        float(loss), float(ref))

    print("KERNEL_OK")
</pallas_src>

<mosaic_0001>
module attributes {stable_mosaic.version = 11 : i64} {
  func.func @_tv_kernel(%arg0: i32, %arg1: memref<8x256xf32, #tpu.memory_space<vmem>>, %arg2: memref<1x255xf32, #tpu.memory_space<vmem>>, %arg3: memref<1x1xf32, #tpu.memory_space<smem>>, %arg4: memref<2xf32, #tpu.memory_space<smem>>) attributes {dimension_semantics = [#tpu.dimension_semantics<arbitrary>], iteration_bounds = array<i64: 1>, scalar_prefetch = 0 : i64, scratch_operands = 1 : i64, tpu.core_type = #tpu.core_type<tc>, window_params = [{transform_indices = @transform_0, window_bounds = array<i64: 8, 256>}, {pipeline_mode = #tpu.pipeline_mode<synchronous>, transform_indices = @transform_1, window_bounds = array<i64: 1, 255>}, {transform_indices = @transform_2, window_bounds = array<i64: 1, 1>}]} {
    %c0_i32 = arith.constant 0 : i32
    %0 = arith.cmpi eq, %arg0, %c0_i32 : i32
    %1 = arith.extui %0 : i1 to i32
    %c0_i32_0 = arith.constant 0 : i32
    %2 = arith.cmpi ne, %1, %c0_i32_0 : i32
    scf.if %2 {
      %cst_10 = arith.constant 0.000000e+00 : f32
      %c0_11 = arith.constant 0 : index
      %32 = memref.load %arg4[%c0_11] : memref<2xf32, #tpu.memory_space<smem>>
      memref.store %cst_10, %arg4[%c0_11] : memref<2xf32, #tpu.memory_space<smem>>
      %cst_12 = arith.constant 0.000000e+00 : f32
      %c1_13 = arith.constant 1 : index
      %33 = memref.load %arg4[%c1_13] : memref<2xf32, #tpu.memory_space<smem>>
      memref.store %cst_12, %arg4[%c1_13] : memref<2xf32, #tpu.memory_space<smem>>
    } else {
    }
    %c0 = arith.constant 0 : index
    %c0_1 = arith.constant 0 : index
    %3 = vector.load %arg1[%c0, %c0_1] : memref<8x256xf32, #tpu.memory_space<vmem>>, vector<8x256xf32>
    %4 = vector.extract_strided_slice %3 {offsets = [0, 16], sizes = [8, 240], strides = [1, 1]} : vector<8x256xf32> to vector<8x240xf32>
    %5 = vector.extract_strided_slice %3 {offsets = [0, 0], sizes = [8, 240], strides = [1, 1]} : vector<8x256xf32> to vector<8x240xf32>
    %6 = arith.subf %4, %5 : vector<8x240xf32>
    %7 = arith.mulf %6, %6 : vector<8x240xf32>
    %8 = vector.shape_cast %7 : vector<8x240xf32> to vector<1x8x240xf32>
    %cst = arith.constant dense<0.000000e+00> : vector<1xf32>
    %9 = vector.multi_reduction <add>, %8, %cst [1, 2] : vector<1x8x240xf32> to vector<1xf32>
    %10 = vector.shape_cast %9 : vector<1xf32> to vector<1x1x1xf32>
    %11 = vector.extract %10[0, 0, 0] : f32 from vector<1x1x1xf32>
    %12 = vector.extract_strided_slice %3 {offsets = [0, 1], sizes = [8, 255], strides = [1, 1]} : vector<8x256xf32> to vector<8x255xf32>
    %13 = vector.extract_strided_slice %3 {offsets = [0, 0], sizes = [8, 255], strides = [1, 1]} : vector<8x256xf32> to vector<8x255xf32>
    %14 = arith.subf %12, %13 : vector<8x255xf32>
    %15 = arith.mulf %14, %14 : vector<8x255xf32>
    %c0_2 = arith.constant 0 : index
    %c0_3 = arith.constant 0 : index
    %16 = vector.load %arg2[%c0_2, %c0_3] : memref<1x255xf32, #tpu.memory_space<vmem>>, vector<1x255xf32>
    %17 = vector.broadcast %16 : vector<1x255xf32> to vector<8x255xf32>
    %18 = arith.mulf %15, %17 : vector<8x255xf32>
    %19 = vector.shape_cast %18 : vector<8x255xf32> to vector<1x8x255xf32>
    %cst_4 = arith.constant dense<0.000000e+00> : vector<1xf32>
    %20 = vector.multi_reduction <add>, %19, %cst_4 [1, 2] : vector<1x8x255xf32> to vector<1xf32>
    %21 = vector.shape_cast %20 : vector<1xf32> to vector<1x1x1xf32>
    %22 = vector.extract %21[0, 0, 0] : f32 from vector<1x1x1xf32>
    %c0_5 = arith.constant 0 : index
    %23 = memref.load %arg4[%c0_5] : memref<2xf32, #tpu.memory_space<smem>>
    %24 = arith.addf %23, %11 : f32
    %c0_6 = arith.constant 0 : index
    %25 = memref.load %arg4[%c0_6] : memref<2xf32, #tpu.memory_space<smem>>
    memref.store %24, %arg4[%c0_6] : memref<2xf32, #tpu.memory_space<smem>>
    %c1 = arith.constant 1 : index
    %26 = memref.load %arg4[%c1] : memref<2xf32, #tpu.memory_space<smem>>
    %27 = arith.addf %26, %22 : f32
    %c1_7 = arith.constant 1 : index
    %28 = memref.load %arg4[%c1_7] : memref<2xf32, #tpu.memory_space<smem>>
    memref.store %27, %arg4[%c1_7] : memref<2xf32, #tpu.memory_space<smem>>
    %c0_i32_8 = arith.constant 0 : i32
    %29 = arith.cmpi eq, %arg0, %c0_i32_8 : i32
    %30 = arith.extui %29 : i1 to i32
    %c0_i32_9 = arith.constant 0 : i32
    %31 = arith.cmpi ne, %30, %c0_i32_9 : i32
    scf.if %31 {
      %c0_10 = arith.constant 0 : index
      %32 = memref.load %arg4[%c0_10] : memref<2xf32, #tpu.memory_space<smem>>
      %cst_11 = arith.constant 0.00104166672 : f32
      %33 = arith.mulf %32, %cst_11 : f32
      %c1_12 = arith.constant 1 : index
      %34 = memref.load %arg4[%c1_12] : memref<2xf32, #tpu.memory_space<smem>>
      %cst_13 = arith.constant 0.00104166672 : f32
      %35 = arith.mulf %34, %cst_13 : f32
      %36 = arith.addf %33, %35 : f32
      %cst_14 = arith.constant 2.000000e+00 : f32
      %37 = arith.mulf %cst_14, %36 : f32
      %cst_15 = arith.constant 5.000000e-01 : f32
      %38 = arith.mulf %37, %cst_15 : f32
      %c0_16 = arith.constant 0 : index
      %c0_17 = arith.constant 0 : index
      %39 = memref.load %arg3[%c0_16, %c0_17] : memref<1x1xf32, #tpu.memory_space<smem>>
      memref.store %38, %arg3[%c0_16, %c0_17] : memref<1x1xf32, #tpu.memory_space<smem>>
    } else {
    }
    return
  }
  func.func @transform_0(%arg0: i32) -> (i32, i32) {
    %c0_i32 = arith.constant 0 : i32
    %c0_i32_0 = arith.constant 0 : i32
    return %arg0, %c0_i32 : i32, i32
  }
  func.func @transform_1(%arg0: i32) -> (i32, i32) {
    %c0_i32 = arith.constant 0 : i32
    %c0_i32_0 = arith.constant 0 : i32
    %c0_i32_1 = arith.constant 0 : i32
    return %c0_i32, %c0_i32_0 : i32, i32
  }
  func.func @transform_2(%arg0: i32) -> (i32, i32) {
    %c0_i32 = arith.constant 0 : i32
    %c0_i32_0 = arith.constant 0 : i32
    %c0_i32_1 = arith.constant 0 : i32
    return %c0_i32, %c0_i32_0 : i32, i32
  }
}

</mosaic_0001>

<bundles_post_ra>
// kernel: tv_loss.1
= control target key start
LH: loop header
LB: loop body
LE: loop exit
PB: predicated region body
PF: predicated region fallthrough
CT: control target
= control target key end

     0   :  { %v71_v1 = vlaneseq  ;;  %s165_s11 = smov 16   ;;  %s166_s12 = smov 1   ;;  %s208_s0 = inlined_call_operand.vmem [shape: f32[8,256], index: 0, kind: input, shape index: {}]   ;;  %s209_s1 = inlined_call_operand.vmem [shape: f32[1,255], index: 1, kind: input, shape index: {}]   ;;  %s210_s2 = inlined_call_operand.hbm [shape: f32[1,1], index: 2, kind: output, shape index: {}]  }
   0x1   :  { %v20_v0 = vld [vmem:[%s208_s0] sm:$0xff] }
   0x2   :  { %24 = vrot.lane.b32.xlu1 %v20_v0, %s165_s11  ;;  %57 = vrot.lane.b32.xlu0 %v20_v0, %s166_s12 }
   0x3   :  { %7 = vsyncpa [#allocation4], 0  ;;  %v21_v2 = vld [vmem:[%s208_s0 + $0x8] sm:$0xff]  ;;  %v72_v3 = vshrl.u32 %v71_v1, 7  ;;  %v69_v4 = vld [vmem:[%s209_s1] sm:$0x3] }
   0x4   :  { %vm28_vm0 = vcmask 130048   ;;  %vm61_vm1 = vcmask 7168   ;;  %s167_s0 = smov 112   ;;  %s168_s1 = smov 127   ;;  %vm42_vm2 = vcmask 916480   ;;  %vm94_vm3 = vcmask 1039360  }
   0x5   :  { %v77_v5 = vsub.s32 1, %v72_v3  ;;  %v73_v6 = vsub.s32 0, %v72_v3  ;;  %s153_s26 = scalar_lea.hbm %s210_s2, 16 }
   0x6   :  { %26 = vrot.lane.b32.xlu1 %v21_v2, %s165_s11  ;;  %59 = vrot.lane.b32.xlu0 %v21_v2, %s166_s12  ;;  %p154_p0 = scmp.ne.s32.totalorder %s210_s2, %s153_s26  ;;  %p157_p1 = scmp.lt.u32.totalorder %s153_s26, %s210_s2 }
   0x7   :  { %v78_v7 = vrot.slane %v69_v4, %v77_v5  ;;  %v74_v8 = vrot.slane %v69_v4, %v73_v6 }
   0x8   :  { %p159_p2 = pnand %p157_p1, %p154_p0 }
   0xa   :  { %81 = vrot.lane.b32.xlu1 %v78_v7, %s166_s12  ;;  %79 = vrot.lane.b32.xlu0 %v74_v8, %s166_s12 }
  0x74   :  { %v25_v9 = vpop.permute.xlu1 %24  ;;  %v58_v10 = vpop.permute.xlu0 %57 }
  0x75   :  { %v32_v11 = vsub.f32 %v20_v0, %v25_v9  ;;  %v65_v13 = vsub.f32 %v20_v0, %v58_v10 }
  0x77   :  { %v34_v12 = vmul.f32 %v32_v11, %v32_v11  ;;  %v67_v20 = vmul.f32 %v65_v13, %v65_v13 }
  0x78   :  { %v27_v14 = vpop.permute.xlu1 %26  ;;  %v60_v15 = vpop.permute.xlu0 %59 }
  0x79   :  { %v29_v16 = vsel %vm28_vm0, %v25_v9, %v27_v14  ;;  %v62_v17 = vsel %vm61_vm1, %v58_v10, %v60_v15  ;;  %38 = vrot.lane.b32.xlu0 %v34_v12, %s167_s0 }
  0x7a   :  { %v33_v18 = vsub.f32 %v21_v2, %v29_v16  ;;  %v66_v19 = vsub.f32 %v21_v2, %v62_v17 }
  0x7c   :  { %v35_v21 = vmul.f32 %v33_v18, %v33_v18  ;;  %v68_v22 = vmul.f32 %v66_v19, %v66_v19  ;;  %v82_v23 = vpop.permute.xlu1 %81  ;;  %v80_v24 = vpop.permute.xlu0 %79 }
  0x7d   :  { %v83_v25 = vsel %vm61_vm1, %v80_v24, %v82_v23  ;;  %v86_v26 = vmul.f32 %v80_v24, %v67_v20 }
  0x7e   :  { %40 = vrot.lane.b32.xlu1 %v35_v21, %s167_s0  ;;  %v87_v27 = vmul.f32 %v83_v25, %v68_v22 }
  0x7f   :  { %90 = vrot.lane.b32.xlu0 %v86_v26, %s168_s1 }
  0x82   :  { %92 = vrot.lane.b32.xlu1 %v87_v27, %s168_s1 }
  0xeb   :  { %v39_v28 = vpop.permute.xlu0 %38 }
  0xf0   :  { %v41_v29 = vpop.permute.xlu1 %40 }
  0xf1   :  { %v43_v30 = vsel %vm42_vm2, %v39_v28, %v41_v29  ;;  %v46_v31 = vsel %vm42_vm2, %v41_v29, 0.0  ;;  %v91_v33 = vpop.permute.xlu0 %90 }
  0xf2   :  { %v47_v32 = vadd.f32 %v46_v31, %v43_v30 }
  0xf4   :  { %v93_v34 = vpop.permute.xlu1 %92  ;;  %48 = vadd.xlane.f32.xlu0 %v47_v32 }
  0xf5   :  { %v95_v35 = vsel %vm94_vm3, %v91_v33, %v93_v34  ;;  %v98_v36 = vsel %vm94_vm3, %v93_v34, 0.0 }
  0xf6   :  { %v99_v37 = vadd.f32 %v98_v36, %v95_v35 }
  0xf8   :  { %100 = vadd.xlane.f32.xlu1 %v99_v37 }
 0x181   :  { %v49_v38 = vpop.xlane.xlu0 %48 }
 0x182   :  { %v50_v39 = vrot.slane %v49_v38, 4 }
 0x184   :  { %v51_v40 = vadd.f32 %v50_v39, %v49_v38 }
 0x185   :  { %v101_v41 = vpop.xlane.xlu1 %100 }
 0x186   :  { %v52_v42 = vrot.slane %v51_v40, 2  ;;  %v102_v43 = vrot.slane %v101_v41, 4 }
 0x188   :  { %v103_v44 = vadd.f32 %v102_v43, %v101_v41  ;;  %v53_v45 = vadd.f32 %v52_v42, %v51_v40 }
 0x18a   :  { %v104_v46 = vrot.slane %v103_v44, 2  ;;  %v54_v47 = vrot.slane %v53_v45, 1 }
 0x18c   :  { %v105_v48 = vadd.f32 %v104_v46, %v103_v44  ;;  %v55_v49 = vadd.f32 %v54_v47, %v53_v45 }
 0x18e   :  { %144 = vpush %v55_v49  ;;  %v106_v50 = vrot.slane %v105_v48, 1 }
 0x190   :  { %v107_v51 = vadd.f32 %v106_v50, %v105_v48 }
 0x192   :  { %146 = vpush %v107_v51 }
 0x1bf   :  { %s145_s17 = spop %144 }
 0x1c0   :  { %s121_s18 = smul.f32 0.0010416667, %s145_s17 }
 0x1c3   :  { %s147_s19 = spop %146 }
 0x1c4   :  { %s123_s20 = smul.f32 0.0010416667, %s147_s19 }
 0x1c6   :  { %s124_s21 = sadd.f32 %s123_s20, %s121_s18 }
 0x1c8   :  { %s125_s22 = smul.f32 2.0, %s124_s21 }
 0x1ca   :  { %s126_s23 = smul.f32 0.5, %s125_s22 }
 0x1cc   :  { %128 = sst [smem:[#allocation3]] %s126_s23 }
 0x1cd   :  { %162 = shalt.err (!%p159_p2)
}
 0x1ce   :  { %s169_s3 = smov [#allocation3]  }
 0x1cf   :  { %136 = dma.smem_to_hbm %s169_s3, 16, %s210_s2, [#allocation4]  }
 0x1d0   :  { %163 = dma.done.wait [#allocation4], 16  }
 0x1d1   :  { %164 = vsyncadd [#allocation4], 4294967280 }
 0x1d2   :  { %140 = sfence }
 0x1d3   :  { %141 = vsyncpa [#allocation4], 1 }

</bundles_post_ra>
